<compile_context>
chip_gen: v7x
topology: tpu7x:2x2x1
jax: 0.10.0
libtpu: 0.0.40
codegen_flags: <defaults>
</compile_context>

<pallas_src>
import functools

import jax
import jax.numpy as jnp
from jax.experimental import pallas as pl
from jax.experimental.pallas import tpu as pltpu


def _round_up(n, m):
    return ((n + m - 1) // m) * m


def _vmem_capacity_bytes():
    try:
        return int(pltpu.get_tpu_info().vmem_capacity_bytes)
    except Exception:
        return 64 << 20  # conservative (v7x per-TC VMEM)


def _encoder_kernel(x_ref, w_ref, vec_ref, o_ref, acc_ref, *, h_real, needs_mask):
    # x_ref:   [TM, TK]       row/K tile of the flattened input
    # w_ref:   [TK, H_pad]    projection-weight K tile
    # vec_ref: [8, H_pad]     row 0 = bias, row 1 = gamma, row 2 = beta
    # o_ref:   [TM, H_pad]
    # acc_ref: [TM, H_pad]    f32 accumulator (VMEM scratch)
    k = pl.program_id(1)

    @pl.when(k == 0)
    def _init():
        acc_ref[...] = jnp.zeros_like(acc_ref)

    # nn.Linear: x @ W^T (W stored pre-transposed as [D_in, H]); MXU matmul
    # with f32 accumulation.
    acc_ref[...] += jnp.dot(x_ref[...], w_ref[...],
                            preferred_element_type=jnp.float32)

    @pl.when(k == pl.num_programs(1) - 1)
    def _finalize():
        bias = vec_ref[0:1, :].astype(jnp.float32)
        gamma = vec_ref[1:2, :].astype(jnp.float32)
        beta = vec_ref[2:3, :].astype(jnp.float32)

        h = acc_ref[...] + bias

        # MambaBlock layers would go here (definition not supplied -> identity).

        # nn.LayerNorm over the real H columns, eps=1e-5 (torch default).
        # Centered two-pass variance (matches torch, avoids cancellation).
        inv_n = jnp.float32(1.0 / h_real)
        if needs_mask:
            lane = jax.lax.broadcasted_iota(jnp.int32, h.shape, 1)
            mask = lane < h_real
            hm = jnp.where(mask, h, 0.0)
            mean = jnp.sum(hm, axis=-1, keepdims=True) * inv_n
            centered = jnp.where(mask, h - mean, 0.0)
        else:
            mean = jnp.sum(h, axis=-1, keepdims=True) * inv_n
            centered = h - mean
        var = jnp.sum(centered * centered, axis=-1, keepdims=True) * inv_n
        normed = centered * jax.lax.rsqrt(var + 1e-5)
        out = normed * gamma + beta
        # Padded gamma/beta lanes are zero, so padded output lanes are zero and
        # get sliced off in the wrapper; store the full lane-dense block.
        o_ref[...] = out.astype(o_ref.dtype)


def _choose_tiles(R, D_pad, H_pad, in_item, out_item, vmem_cap):
    # K tile: keep the weight tile(s) under ~1/3 of VMEM capacity.
    TK = 128
    for t in range(D_pad, 0, -128):
        if D_pad % t != 0:
            continue
        bufs = 1 if t == D_pad else 2
        if bufs * t * H_pad * in_item <= vmem_cap // 3:
            TK = t
            break
    k_tiles = D_pad // TK
    w_bufs = 1 if k_tiles == 1 else 2

    # Row tile: biggest (<=1024) that fits ~60% of VMEM; force >=2 row tiles
    # when R > 8 so both v7x TensorCores get work and DMA overlaps compute.
    if R > 8:
        tm_cap = min(1024, max(8, _round_up((R + 1) // 2, 8)))
    else:
        tm_cap = 8
    budget = int(vmem_cap * 0.6)
    TM = 8
    for t in (1024, 512, 256, 128, 64, 32, 16, 8):
        if t > tm_cap:
            continue
        fp = (2 * t * TK * in_item            # x tiles (double-buffered)
              + w_bufs * TK * H_pad * in_item  # weight tile(s)
              + 2 * t * H_pad * out_item       # output tiles
              + t * H_pad * 4                  # f32 accumulator scratch
              + 2 * 8 * H_pad * in_item)       # fused bias/gamma/beta
        if fp <= budget:
            TM = t
            break
    return TM, TK, k_tiles, w_bufs


def vision_encoder_forward(x, w, b, gamma, beta, *, matmul_dtype=None):
    """x: [B, S, D_in]; w: [D_in, H]; b, gamma, beta: [H] -> [B, S, H]."""
    B, S, D_in = x.shape
    H = w.shape[1]
    R = B * S

    compute_dtype = matmul_dtype if matmul_dtype is not None else x.dtype
    in_item = jnp.dtype(compute_dtype).itemsize
    out_item = jnp.dtype(x.dtype).itemsize

    # Pad feature dims to lane multiples (MXU-shaped matmul, lane-dense stores).
    D_pad = _round_up(D_in, 128)
    H_pad = _round_up(H, 128)

    vmem_cap = _vmem_capacity_bytes()
    TM, TK, k_tiles, w_bufs = _choose_tiles(R, D_pad, H_pad, in_item, out_item, vmem_cap)
    R_pad = _round_up(max(R, TM), TM)
    row_tiles = R_pad // TM
    grid = (row_tiles, k_tiles)

    # ---- Prepare operands (skip padding when already aligned) ----
    x2d = x.reshape(R, D_in)
    w_p = w
    if matmul_dtype is not None:
        x2d = x2d.astype(matmul_dtype)
        w_p = w_p.astype(matmul_dtype)
    if (R_pad - R) or (D_pad - D_in):
        x2d = jnp.pad(x2d, ((0, R_pad - R), (0, D_pad - D_in)))
    if (D_pad - D_in) or (H_pad - H):
        w_p = jnp.pad(w_p, ((0, D_pad - D_in), (0, H_pad - H)))
    vec = jnp.stack([b, gamma, beta], axis=0)          # [3, H]
    vec = jnp.pad(vec, ((0, 5), (0, H_pad - H)))       # [8, H_pad]

    # ---- VMEM budget & cost hint (padded sizes) ----
    footprint = (2 * TM * TK * in_item
                 + w_bufs * TK * H_pad * in_item
                 + 2 * TM * H_pad * out_item
                 + TM * H_pad * 4
                 + 2 * 8 * H_pad * in_item)
    vmem_limit = int(min(max(footprint + (4 << 20), 32 << 20),
                         vmem_cap - (8 << 20)))

    w_reads = 1 if k_tiles == 1 else row_tiles
    cost = pl.CostEstimate(
        flops=2 * R_pad * D_pad * H_pad,
        transcendentals=R_pad,  # one rsqrt per row
        bytes_accessed=(R_pad * D_pad * in_item
                        + w_reads * D_pad * H_pad * in_item
                        + 8 * H_pad * jnp.dtype(vec.dtype).itemsize
                        + R_pad * H_pad * out_item),
    )

    kernel = functools.partial(_encoder_kernel, h_real=H, needs_mask=(H != H_pad))

    def _run(single_buffer_consts):
        w_kwargs = {}
        vec_kwargs = {}
        if single_buffer_consts:
            vec_kwargs = dict(pipeline_mode=pl.Buffered(1))
            if k_tiles == 1:
                w_kwargs = dict(pipeline_mode=pl.Buffered(1))
        in_specs = [
            pl.BlockSpec((TM, TK), lambda i, k: (i, k)),
            pl.BlockSpec((TK, H_pad), lambda i, k: (k, 0), **w_kwargs),
            pl.BlockSpec((8, H_pad), lambda i, k: (0, 0), **vec_kwargs),
        ]
        return pl.pallas_call(
            kernel,
            out_shape=jax.ShapeDtypeStruct((R_pad, H_pad), x.dtype),
            grid_spec=pltpu.PrefetchScalarGridSpec(
                num_scalar_prefetch=0,
                grid=grid,
                in_specs=in_specs,
                out_specs=pl.BlockSpec((TM, H_pad), lambda i, k: (i, 0)),
                scratch_shapes=[pltpu.VMEM((TM, H_pad), jnp.float32)],
            ),
            compiler_params=pltpu.CompilerParams(
                dimension_semantics=("parallel", "arbitrary"),
                vmem_limit_bytes=vmem_limit,
            ),
            cost_estimate=cost,
        )(x2d, w_p, vec)

    try:
        out2d = _run(True)
    except Exception:
        # Fallback if this JAX build rejects Buffered(1) on constant operands.
        out2d = _run(False)

    if (R_pad != R) or (H_pad != H):
        out2d = out2d[:R, :H]
    return out2d.reshape(B, S, H)


def _reference(x, w, b, gamma, beta):
    h = jnp.einsum("bsd,dh->bsh", x, w) + b
    mean = jnp.mean(h, axis=-1, keepdims=True)
    var = jnp.mean((h - mean) ** 2, axis=-1, keepdims=True)
    return (h - mean) / jnp.sqrt(var + 1e-5) * gamma + beta


if __name__ == "__main__":
    # Small shapes consistent with the module's forward:
    B, S = 2, 8          # batch, sequence of patch tokens
    input_size = 16
    hidden_size = 32
    num_layers = 2       # MambaBlock layers (identity here, see TODO above)
    num_heads = 4
    dropout = 0.1

    key = jax.random.PRNGKey(0)
    kx, kw, kb = jax.random.split(key, 3)

    x = jax.random.normal(kx, (B, S, input_size), dtype=jnp.float32)

    # Deterministic parameter init (synthetic, not a checkpoint load).
    # torch stores Linear weight as [out, in]; we keep it transposed [in, out]
    # so the kernel's matmul is a plain x @ w.
    w = jax.random.normal(kw, (input_size, hidden_size), dtype=jnp.float32) * 0.05
    b = jax.random.normal(kb, (hidden_size,), dtype=jnp.float32) * 0.05
    gamma = jnp.ones((hidden_size,), dtype=jnp.float32)
    beta = jnp.zeros((hidden_size,), dtype=jnp.float32)

    out = vision_encoder_forward(x, w, b, gamma, beta)
    out = jax.block_until_ready(out)

    ref = _reference(x, w, b, gamma, beta)
    assert out.shape == (B, S, hidden_size)
    assert jnp.allclose(out, ref, atol=1e-4, rtol=1e-4)

    print("KERNEL_OK")
</pallas_src>

<mosaic_0001>
module attributes {stable_mosaic.version = 11 : i64} {
  func.func @_encoder_kernel(%arg0: i32, %arg1: i32, %arg2: memref<8x128xf32, #tpu.memory_space<vmem>>, %arg3: memref<128x128xf32, #tpu.memory_space<vmem>>, %arg4: memref<8x128xf32, #tpu.memory_space<vmem>>, %arg5: memref<8x128xf32, #tpu.memory_space<vmem>>, %arg6: memref<8x128xf32, #tpu.memory_space<vmem>>) attributes {dimension_semantics = [#tpu.dimension_semantics<parallel>, #tpu.dimension_semantics<arbitrary>], iteration_bounds = array<i64: 2, 1>, scalar_prefetch = 0 : i64, scratch_operands = 1 : i64, tpu.core_type = #tpu.core_type<tc>, window_params = [{transform_indices = @transform_0, window_bounds = array<i64: 8, 128>}, {pipeline_mode = #tpu.pipeline_mode<synchronous>, transform_indices = @transform_1, window_bounds = array<i64: 128, 128>}, {pipeline_mode = #tpu.pipeline_mode<synchronous>, transform_indices = @transform_2, window_bounds = array<i64: 8, 128>}, {transform_indices = @transform_3, window_bounds = array<i64: 8, 128>}]} {
    %c0_i32 = arith.constant 0 : i32
    %0 = arith.cmpi eq, %arg1, %c0_i32 : i32
    %1 = arith.extui %0 : i1 to i32
    %c0_i32_0 = arith.constant 0 : i32
    %2 = arith.cmpi ne, %1, %c0_i32_0 : i32
    scf.if %2 {
      %cst_10 = arith.constant 0.000000e+00 : f32
      %12 = vector.broadcast %cst_10 : f32 to vector<8x128xf32>
      %c0_11 = arith.constant 0 : index
      %c0_12 = arith.constant 0 : index
      %13 = vector.load %arg6[%c0_11, %c0_12] : memref<8x128xf32, #tpu.memory_space<vmem>>, vector<8x128xf32>
      tpu.vector_store %arg6[%c0_11, %c0_12], %12 {strides = array<i32>} : memref<8x128xf32, #tpu.memory_space<vmem>>, vector<8x128xf32>,
    } else {
    }
    %c0 = arith.constant 0 : index
    %c0_1 = arith.constant 0 : index
    %3 = vector.load %arg6[%c0, %c0_1] : memref<8x128xf32, #tpu.memory_space<vmem>>, vector<8x128xf32>
    %c0_2 = arith.constant 0 : index
    %c0_3 = arith.constant 0 : index
    %4 = vector.load %arg2[%c0_2, %c0_3] : memref<8x128xf32, #tpu.memory_space<vmem>>, vector<8x128xf32>
    %c0_4 = arith.constant 0 : index
    %c0_5 = arith.constant 0 : index
    %5 = vector.load %arg3[%c0_4, %c0_5] : memref<128x128xf32, #tpu.memory_space<vmem>>, vector<128x128xf32>
    %cst = arith.constant dense<0.000000e+00> : vector<8x128xf32>
    %6 = tpu.matmul %4, %5, %cst {dimension_numbers = #tpu.dot_dimension_numbers<[1], [0], [0], [1], [0, 0, 1, 1], [], []>} : vector<8x128xf32>, vector<128x128xf32>, vector<8x128xf32> -> vector<8x128xf32>
    %7 = arith.addf %3, %6 : vector<8x128xf32>
    %c0_6 = arith.constant 0 : index
    %c0_7 = arith.constant 0 : index
    %8 = vector.load %arg6[%c0_6, %c0_7] : memref<8x128xf32, #tpu.memory_space<vmem>>, vector<8x128xf32>
    tpu.vector_store %arg6[%c0_6, %c0_7], %7 {strides = array<i32>} : memref<8x128xf32, #tpu.memory_space<vmem>>, vector<8x128xf32>,
    %c0_i32_8 = arith.constant 0 : i32
    %9 = arith.cmpi eq, %arg1, %c0_i32_8 : i32
    %10 = arith.extui %9 : i1 to i32
    %c0_i32_9 = arith.constant 0 : i32
    %11 = arith.cmpi ne, %10, %c0_i32_9 : i32
    scf.if %11 {
      %c0_10 = arith.constant 0 : index
      %c0_11 = arith.constant 0 : index
      %12 = vector.load %arg4[%c0_10, %c0_11] : memref<8x128xf32, #tpu.memory_space<vmem>>, vector<1x128xf32>
      %c1 = arith.constant 1 : index
      %c0_12 = arith.constant 0 : index
      %13 = vector.load %arg4[%c1, %c0_12] : memref<8x128xf32, #tpu.memory_space<vmem>>, vector<1x128xf32>
      %c2 = arith.constant 2 : index
      %c0_13 = arith.constant 0 : index
      %14 = vector.load %arg4[%c2, %c0_13] : memref<8x128xf32, #tpu.memory_space<vmem>>, vector<1x128xf32>
      %c0_14 = arith.constant 0 : index
      %c0_15 = arith.constant 0 : index
      %15 = vector.load %arg6[%c0_14, %c0_15] : memref<8x128xf32, #tpu.memory_space<vmem>>, vector<8x128xf32>
      %16 = vector.broadcast %12 : vector<1x128xf32> to vector<8x128xf32>
      %17 = arith.addf %15, %16 : vector<8x128xf32>
      %18 = tpu.iota {dimensions = array<i32: 1>} : vector<8x128xi32>
      %c32_i32 = arith.constant 32 : i32
      %19 = vector.broadcast %c32_i32 : i32 to vector<8x128xi32>
      %20 = arith.cmpi slt, %18, %19 : vector<8x128xi32>
      %cst_16 = arith.constant 0.000000e+00 : f32
      %21 = vector.broadcast %cst_16 : f32 to vector<8x128xf32>
      %22 = arith.select %20, %17, %21 : vector<8x128xi1>, vector<8x128xf32>
      %cst_17 = arith.constant dense<0.000000e+00> : vector<8xf32>
      %23 = vector.multi_reduction <add>, %22, %cst_17 [1] : vector<8x128xf32> to vector<8xf32>
      %24 = vector.shape_cast %23 : vector<8xf32> to vector<8x1xf32>
      %cst_18 = arith.constant 3.125000e-02 : f32
      %25 = vector.broadcast %cst_18 : f32 to vector<8x1xf32>
      %26 = arith.mulf %24, %25 : vector<8x1xf32>
      %27 = vector.broadcast %26 : vector<8x1xf32> to vector<8x128xf32>
      %28 = arith.subf %17, %27 : vector<8x128xf32>
      %cst_19 = arith.constant 0.000000e+00 : f32
      %29 = vector.broadcast %cst_19 : f32 to vector<8x128xf32>
      %30 = arith.select %20, %28, %29 : vector<8x128xi1>, vector<8x128xf32>
      %31 = arith.mulf %30, %30 : vector<8x128xf32>
      %cst_20 = arith.constant dense<0.000000e+00> : vector<8xf32>
      %32 = vector.multi_reduction <add>, %31, %cst_20 [1] : vector<8x128xf32> to vector<8xf32>
      %33 = vector.shape_cast %32 : vector<8xf32> to vector<8x1xf32>
      %cst_21 = arith.constant 3.125000e-02 : f32
      %34 = vector.broadcast %cst_21 : f32 to vector<8x1xf32>
      %35 = arith.mulf %33, %34 : vector<8x1xf32>
      %cst_22 = arith.constant 9.99999974E-6 : f32
      %36 = vector.broadcast %cst_22 : f32 to vector<8x1xf32>
      %37 = arith.addf %35, %36 : vector<8x1xf32>
      %38 = math.rsqrt %37 : vector<8x1xf32>
      %39 = vector.broadcast %38 : vector<8x1xf32> to vector<8x128xf32>
      %40 = arith.mulf %30, %39 : vector<8x128xf32>
      %41 = vector.broadcast %13 : vector<1x128xf32> to vector<8x128xf32>
      %42 = arith.mulf %40, %41 : vector<8x128xf32>
      %43 = vector.broadcast %14 : vector<1x128xf32> to vector<8x128xf32>
      %44 = arith.addf %42, %43 : vector<8x128xf32>
      %c0_23 = arith.constant 0 : index
      %c0_24 = arith.constant 0 : index
      %45 = vector.load %arg5[%c0_23, %c0_24] : memref<8x128xf32, #tpu.memory_space<vmem>>, vector<8x128xf32>
      tpu.vector_store %arg5[%c0_23, %c0_24], %44 {strides = array<i32>} : memref<8x128xf32, #tpu.memory_space<vmem>>, vector<8x128xf32>,
    } else {
    }
    return
  }
  func.func @transform_0(%arg0: i32, %arg1: i32) -> (i32, i32) {
    %c0_i32 = arith.constant 0 : i32
    return %arg0, %arg1 : i32, i32
  }
  func.func @transform_1(%arg0: i32, %arg1: i32) -> (i32, i32) {
    %c0_i32 = arith.constant 0 : i32
    %c0_i32_0 = arith.constant 0 : i32
    return %arg1, %c0_i32 : i32, i32
  }
  func.func @transform_2(%arg0: i32, %arg1: i32) -> (i32, i32) {
    %c0_i32 = arith.constant 0 : i32
    %c0_i32_0 = arith.constant 0 : i32
    %c0_i32_1 = arith.constant 0 : i32
    return %c0_i32, %c0_i32_0 : i32, i32
  }
  func.func @transform_3(%arg0: i32, %arg1: i32) -> (i32, i32) {
    %c0_i32 = arith.constant 0 : i32
    %c0_i32_0 = arith.constant 0 : i32
    return %arg0, %c0_i32 : i32, i32
  }
}

module attributes {stable_mosaic.version = 11 : i64} {
  func.func @_encoder_kernel(%arg0: i32, %arg1: i32, %arg2: memref<8x128xf32, #tpu.memory_space<vmem>>, %arg3: memref<128x128xf32, #tpu.memory_space<vmem>>, %arg4: memref<8x128xf32, #tpu.memory_space<vmem>>, %arg5: memref<8x128xf32, #tpu.memory_space<vmem>>, %arg6: memref<8x128xf32, #tpu.memory_space<vmem>>) attributes {dimension_semantics = [#tpu.dimension_semantics<parallel>, #tpu.dimension_semantics<arbitrary>], iteration_bounds = array<i64: 2, 1>, scalar_prefetch = 0 : i64, scratch_operands = 1 : i64, tpu.core_type = #tpu.core_type<tc>, window_params = [{transform_indices = @transform_0, window_bounds = array<i64: 8, 128>}, {transform_indices = @transform_1, window_bounds = array<i64: 128, 128>}, {pipeline_mode = #tpu.pipeline_mode<synchronous>, transform_indices = @transform_2, window_bounds = array<i64: 8, 128>}, {transform_indices = @transform_3, window_bounds = array<i64: 8, 128>}]} {
    %c0_i32 = arith.constant 0 : i32
    %0 = arith.cmpi eq, %arg1, %c0_i32 : i32
    %1 = arith.extui %0 : i1 to i32
    %c0_i32_0 = arith.constant 0 : i32
    %2 = arith.cmpi ne, %1, %c0_i32_0 : i32
    scf.if %2 {
      %cst_10 = arith.constant 0.000000e+00 : f32
      %12 = vector.broadcast %cst_10 : f32 to vector<8x128xf32>
      %c0_11 = arith.constant 0 : index
      %c0_12 = arith.constant 0 : index
      %13 = vector.load %arg6[%c0_11, %c0_12] : memref<8x128xf32, #tpu.memory_space<vmem>>, vector<8x128xf32>
      tpu.vector_store %arg6[%c0_11, %c0_12], %12 {strides = array<i32>} : memref<8x128xf32, #tpu.memory_space<vmem>>, vector<8x128xf32>,
    } else {
    }
    %c0 = arith.constant 0 : index
    %c0_1 = arith.constant 0 : index
    %3 = vector.load %arg6[%c0, %c0_1] : memref<8x128xf32, #tpu.memory_space<vmem>>, vector<8x128xf32>
    %c0_2 = arith.constant 0 : index
    %c0_3 = arith.constant 0 : index
    %4 = vector.load %arg2[%c0_2, %c0_3] : memref<8x128xf32, #tpu.memory_space<vmem>>, vector<8x128xf32>
    %c0_4 = arith.constant 0 : index
    %c0_5 = arith.constant 0 : index
    %5 = vector.load %arg3[%c0_4, %c0_5] : memref<128x128xf32, #tpu.memory_space<vmem>>, vector<128x128xf32>
    %cst = arith.constant dense<0.000000e+00> : vector<8x128xf32>
    %6 = tpu.matmul %4, %5, %cst {dimension_numbers = #tpu.dot_dimension_numbers<[1], [0], [0], [1], [0, 0, 1, 1], [], []>} : vector<8x128xf32>, vector<128x128xf32>, vector<8x128xf32> -> vector<8x128xf32>
    %7 = arith.addf %3, %6 : vector<8x128xf32>
    %c0_6 = arith.constant 0 : index
    %c0_7 = arith.constant 0 : index
    %8 = vector.load %arg6[%c0_6, %c0_7] : memref<8x128xf32, #tpu.memory_space<vmem>>, vector<8x128xf32>
    tpu.vector_store %arg6[%c0_6, %c0_7], %7 {strides = array<i32>} : memref<8x128xf32, #tpu.memory_space<vmem>>, vector<8x128xf32>,
    %c0_i32_8 = arith.constant 0 : i32
    %9 = arith.cmpi eq, %arg1, %c0_i32_8 : i32
    %10 = arith.extui %9 : i1 to i32
    %c0_i32_9 = arith.constant 0 : i32
    %11 = arith.cmpi ne, %10, %c0_i32_9 : i32
    scf.if %11 {
      %c0_10 = arith.constant 0 : index
      %c0_11 = arith.constant 0 : index
      %12 = vector.load %arg4[%c0_10, %c0_11] : memref<8x128xf32, #tpu.memory_space<vmem>>, vector<1x128xf32>
      %c1 = arith.constant 1 : index
      %c0_12 = arith.constant 0 : index
      %13 = vector.load %arg4[%c1, %c0_12] : memref<8x128xf32, #tpu.memory_space<vmem>>, vector<1x128xf32>
      %c2 = arith.constant 2 : index
      %c0_13 = arith.constant 0 : index
      %14 = vector.load %arg4[%c2, %c0_13] : memref<8x128xf32, #tpu.memory_space<vmem>>, vector<1x128xf32>
      %c0_14 = arith.constant 0 : index
      %c0_15 = arith.constant 0 : index
      %15 = vector.load %arg6[%c0_14, %c0_15] : memref<8x128xf32, #tpu.memory_space<vmem>>, vector<8x128xf32>
      %16 = vector.broadcast %12 : vector<1x128xf32> to vector<8x128xf32>
      %17 = arith.addf %15, %16 : vector<8x128xf32>
      %18 = tpu.iota {dimensions = array<i32: 1>} : vector<8x128xi32>
      %c32_i32 = arith.constant 32 : i32
      %19 = vector.broadcast %c32_i32 : i32 to vector<8x128xi32>
      %20 = arith.cmpi slt, %18, %19 : vector<8x128xi32>
      %cst_16 = arith.constant 0.000000e+00 : f32
      %21 = vector.broadcast %cst_16 : f32 to vector<8x128xf32>
      %22 = arith.select %20, %17, %21 : vector<8x128xi1>, vector<8x128xf32>
      %cst_17 = arith.constant dense<0.000000e+00> : vector<8xf32>
      %23 = vector.multi_reduction <add>, %22, %cst_17 [1] : vector<8x128xf32> to vector<8xf32>
      %24 = vector.shape_cast %23 : vector<8xf32> to vector<8x1xf32>
      %cst_18 = arith.constant 3.125000e-02 : f32
      %25 = vector.broadcast %cst_18 : f32 to vector<8x1xf32>
      %26 = arith.mulf %24, %25 : vector<8x1xf32>
      %27 = vector.broadcast %26 : vector<8x1xf32> to vector<8x128xf32>
      %28 = arith.subf %17, %27 : vector<8x128xf32>
      %cst_19 = arith.constant 0.000000e+00 : f32
      %29 = vector.broadcast %cst_19 : f32 to vector<8x128xf32>
      %30 = arith.select %20, %28, %29 : vector<8x128xi1>, vector<8x128xf32>
      %31 = arith.mulf %30, %30 : vector<8x128xf32>
      %cst_20 = arith.constant dense<0.000000e+00> : vector<8xf32>
      %32 = vector.multi_reduction <add>, %31, %cst_20 [1] : vector<8x128xf32> to vector<8xf32>
      %33 = vector.shape_cast %32 : vector<8xf32> to vector<8x1xf32>
      %cst_21 = arith.constant 3.125000e-02 : f32
      %34 = vector.broadcast %cst_21 : f32 to vector<8x1xf32>
      %35 = arith.mulf %33, %34 : vector<8x1xf32>
      %cst_22 = arith.constant 9.99999974E-6 : f32
      %36 = vector.broadcast %cst_22 : f32 to vector<8x1xf32>
      %37 = arith.addf %35, %36 : vector<8x1xf32>
      %38 = math.rsqrt %37 : vector<8x1xf32>
      %39 = vector.broadcast %38 : vector<8x1xf32> to vector<8x128xf32>
      %40 = arith.mulf %30, %39 : vector<8x128xf32>
      %41 = vector.broadcast %13 : vector<1x128xf32> to vector<8x128xf32>
      %42 = arith.mulf %40, %41 : vector<8x128xf32>
      %43 = vector.broadcast %14 : vector<1x128xf32> to vector<8x128xf32>
      %44 = arith.addf %42, %43 : vector<8x128xf32>
      %c0_23 = arith.constant 0 : index
      %c0_24 = arith.constant 0 : index
      %45 = vector.load %arg5[%c0_23, %c0_24] : memref<8x128xf32, #tpu.memory_space<vmem>>, vector<8x128xf32>
      tpu.vector_store %arg5[%c0_23, %c0_24], %44 {strides = array<i32>} : memref<8x128xf32, #tpu.memory_space<vmem>>, vector<8x128xf32>,
    } else {
    }
    return
  }
  func.func @transform_0(%arg0: i32, %arg1: i32) -> (i32, i32) {
    %c0_i32 = arith.constant 0 : i32
    return %arg0, %arg1 : i32, i32
  }
  func.func @transform_1(%arg0: i32, %arg1: i32) -> (i32, i32) {
    %c0_i32 = arith.constant 0 : i32
    %c0_i32_0 = arith.constant 0 : i32
    return %arg1, %c0_i32 : i32, i32
  }
  func.func @transform_2(%arg0: i32, %arg1: i32) -> (i32, i32) {
    %c0_i32 = arith.constant 0 : i32
    %c0_i32_0 = arith.constant 0 : i32
    %c0_i32_1 = arith.constant 0 : i32
    return %c0_i32, %c0_i32_0 : i32, i32
  }
  func.func @transform_3(%arg0: i32, %arg1: i32) -> (i32, i32) {
    %c0_i32 = arith.constant 0 : i32
    %c0_i32_0 = arith.constant 0 : i32
    return %arg0, %c0_i32 : i32, i32
  }
}

</mosaic_0001>

<bundles_post_ra>
// kernel: tpu_custom_call.1
= control target key start
LH: loop header
LB: loop body
LE: loop exit
PB: predicated region body
PF: predicated region fallthrough
CT: control target
= control target key end

     0   :  { %8 = vsyncpa [#allocation4], 0  ;;  %s1131_s0 = inlined_call_operand.hbm [shape: f32[16,128], index: 0, kind: input, shape index: {}]   ;;  %s1132_s1 = inlined_call_operand.hbm [shape: f32[128,128], index: 1, kind: input, shape index: {}]   ;;  %s1133_s2 = inlined_call_operand.hbm [shape: f32[8,128], index: 2, kind: input, shape index: {}]   ;;  %s1134_s3 = inlined_call_operand.hbm [shape: f32[16,128], index: 3, kind: output, shape index: {}]  }
   0x1   :  { %10 = vsyncpa [#allocation4 + $0x1], 0 }
   0x2   :  { %11 = vsyncpa [#allocation7], 0 }
   0x3   :  { %12 = vsyncpa [#allocation5], 0 }
   0x4   :  { %14 = vsyncpa [#allocation5 + $0x1], 0  ;;  %s874_s12 = smov 0   ;;  %s876_s13 = smov 0  }
   0x5   :  { %s878_s14 = smov 0   ;;  %s880_s15 = smov 0  }
   0x6   :  { %s882_s16 = smov 0   ;;  %s884_s17 = smov 0  }
   0x7 LB: > { %s485_s18 = sadd.s32 4294967295, %s843_s17   ;;  %s486_s19 = sadd.s32 4294967294, %s843_s17   ;;  %s843_s17 = sphi %s884_s17, %s20_s17   ;;  %s839_s16 = sphi %s882_s16, %s1156_s16   ;;  %s835_s15 = sphi %s880_s15, %s1155_s15   ;;  %s831_s14 = sphi %s878_s14, %s1154_s14   ;;  %s827_s13 = sphi %s876_s13, %s1153_s13   ;;  %s823_s12 = sphi %s874_s12, %s1152_s12  }
   0x8   : > { %p54_p0 = scmp.ne.s32.totalorder %s827_s13, %s823_s12  ;;  %p908_p1 = scmp.eq.s32.totalorder %s485_s18, 0 }
   0x9   : > { %p912_p2 = scmp.eq.s32.totalorder %s485_s18, 1  ;;  %p131_p3 = scmp.eq.s32.totalorder %s486_s19, 1 }
   0xa   : > { %s1139_s20 = scalar_select %p908_p1, 1, 0 }
   0xb   : > { %p918_p4 = por %p908_p1, %p54_p0  ;;  %p487_p5 = scmp.ge.s32.totalorder %s843_s17, 1 }
   0xc   : > { %p923_p6 = por %p131_p3, %p54_p0  ;;  %p138_p7 = scmp.lt.s32.totalorder %s843_s17, 3 }
   0xd   : > { %s1141_s22 = scalar_select %p918_p4, 1, 0 }
   0xe   : > { %s1142_s23 = scalar_select %p923_p6, 1, 0 }
   0xf   : > { %p928_p8 = pnand %p487_p5, %p138_p7  ;;  %s845_s25 = smov [#allocation6]  }
  0x10   : > { %s153_s26 = sshll.u32 %s845_s25, 4  ;;  %s846_s28 = smov [#allocation8]   ;;  %s932_s26 = int_to_ptr.vmem [resolvable:$true] %s153_s26 }
  0x11   : > { %p593_p9 = pneg %p928_p8  ;;  %s167_s29 = sshll.u32 %s846_s28, 4  ;;  %s943_s29 = int_to_ptr.vmem [resolvable:$true] %s167_s29 }
  0x12   : > { %s671_s5 = scalar_lea.hbm %s1132_s1, 2048 }
  0x13   : > { %p939_p11 = pnand %p593_p9, %p908_p1  ;;  %p672_p12 = scmp.ne.s32.totalorder %s1132_s1, %s671_s5 }
  0x14   : > { %p678_p5 = scmp.lt.u32.totalorder %s671_s5, %s1132_s1 }
  0x15   : > { %p673_p13 = pneg %p939_p11 }
  0x17   : > { %p674_p0 = pnand %p673_p13, %p672_p12 }
  0x19   : > { %p675_p3 = pneg %p674_p0 }
  0x1b   : > { %p680_p7 = pnand %p678_p5, %p675_p3 }
  0x1d   : > { %683 = shalt.err (!%p680_p7)
}
  0x1e   : > { %s684_s10 = scalar_lea.vmem %s932_s26, 2048  ;;  %p692_p1 = scmp.lt.s32.totalorder %s932_s26, %s932_s26 }
  0x1f   : > { %p685_p9 = scmp.ne.s32.totalorder %s932_s26, %s684_s10  ;;  %p693_p12 = scmp.lt.s32.totalorder %s684_s10, %s684_s10 }
  0x21   : > { %p687_p10 = pnand %p685_p9, %p673_p13  ;;  %p694_p0 = por %p693_p12, %p692_p1 }
  0x23   : > { %p688_p6 = pneg %p687_p10 }
  0x25   : > { %p695_p4 = pnand %p694_p0, %p688_p6 }
  0x27   : > { %698 = shalt.err (!%p695_p4)
}
  0x28   : > { %s847_s11 = smov 128   ;;  %s848_s18 = smov 8  }
  0x29   : > { %596 = dma.hbm_to_vmem [thread:$0]  (!%p939_p11), %s1132_s1, 2048, %s932_s26, [#allocation7], %s847_s11, %s847_s11, %s848_s18  }
  0x2a   : > { %s699_s4 = scalar_lea.hbm %s1133_s2, 128 }
  0x2b   : > { %p700_p1 = scmp.ne.s32.totalorder %s1133_s2, %s699_s4  ;;  %p706_p10 = scmp.lt.u32.totalorder %s699_s4, %s1133_s2 }
  0x2d   : > { %p702_p4 = pnand %p700_p1, %p673_p13 }
  0x2f   : > { %p703_p6 = pneg %p702_p4 }
  0x31   : > { %p708_p3 = pnand %p706_p10, %p703_p6 }
  0x33   : > { %711 = shalt.err (!%p708_p3)
}
  0x34   : > { %s712_s26 = scalar_lea.vmem %s943_s29, 128  ;;  %p720_p12 = scmp.lt.s32.totalorder %s943_s29, %s943_s29 }
  0x35   : > { %p713_p5 = scmp.ne.s32.totalorder %s943_s29, %s712_s26  ;;  %p721_p0 = scmp.lt.s32.totalorder %s712_s26, %s712_s26 }
  0x37   : > { %p715_p7 = pnand %p713_p5, %p673_p13  ;;  %p722_p1 = por %p721_p0, %p720_p12 }
  0x39   : > { %p716_p9 = pneg %p715_p7 }
  0x3b   : > { %p723_p4 = pnand %p722_p1, %p716_p9 }
  0x3d   : > { %726 = shalt.err (!%p723_p4)
}
  0x3e   : > { %599 = dma.hbm_to_vmem [thread:$0]  (!%p939_p11), %s1133_s2, 128, %s943_s29, [#allocation7]  }
  0x3f   : > { %s32_s11 = sadd.s32 1, %s839_s16  ;;  %s41_s18 = sadd.s32 1, %s831_s14 }
  0x40   : > { %p34_p13 = scmp.ge.s32.totalorder %s32_s11, 2  ;;  %p48_p6 = scmp.ne.s32.totalorder %s831_s14, %s827_s13 }
  0x41   : > { %p49_p10 = scmp.eq.s32.totalorder %s843_s17, 0  ;;  %p610_p3 = scmp.lt.s32.totalorder %s843_s17, 2 }
  0x42   : > { %s1158_s11 = smov (%p34_p13, %s32_s11), 0  ;;  %p1007_p7 = por %p912_p2, %p48_p6 }
  0x43   : > { %p50_p5 = por %p49_p10, %p48_p6  ;;  %s36_s19 = ssub.s32 %s839_s16, %s1158_s11 }
  0x44   : > { %s1145_s27 = scalar_select %p1007_p7, 1, 0 }
  0x45   : > { %s178_s25 = sand.u32 1, %s831_s14   ;;  %p39_p9 = scmp.eq.s32.totalorder %s36_s19, 0 }
  0x46   : > { %s491_s29 = sshll.u32 %s178_s25, 3  ;;  %s492_s28 = sshll.u32 %s839_s16, 7 }
  0x47   : > { %s1016_s30 = scalar_select %p39_p9, %s831_s14, %s41_s18  }
  0x48   : > { %s1021_s6 = scalar_lea.hbm %s1131_s0, %s492_s28  ;;  %s182_s21 = scalar_lea.vmem [#allocation3], %s491_s29 }
  0x49   : > { %s190_s7 = sshll.u32 %s182_s21, 4  ;;  %p1025_p2 = pnand %p610_p3, %p50_p5  ;;  %s1029_s7 = int_to_ptr.vmem [resolvable:$true] %s190_s7 }
  0x4a   : > { %s179_s26 = scalar_lea.sflag [#allocation4], %s178_s25  ;;  %s727_s9 = scalar_lea.hbm %s1021_s6, 128 }
  0x4b   : > { %p728_p11 = scmp.ne.s32.totalorder %s1021_s6, %s727_s9  ;;  %p729_p12 = pneg %p1025_p2 }
  0x4c   : > { %s732_s19 = scalar_lea.hbm %s1131_s0, 256  ;;  %p733_p4 = scmp.lt.u32.totalorder %s1021_s6, %s1131_s0 }
  0x4d   : > { %p730_p0 = pnand %p729_p12, %p728_p11  ;;  %p734_p13 = scmp.lt.u32.totalorder %s732_s19, %s727_s9 }
  0x4e   : > { %p736_p10 = scmp.lt.u32.totalorder %s727_s9, %s1021_s6 }
  0x4f   : > { %p731_p1 = pneg %p730_p0  ;;  %p735_p6 = por %p734_p13, %p733_p4 }
  0x51   : > { %p737_p3 = por %p736_p10, %p735_p6 }
  0x53   : > { %p738_p5 = pnand %p737_p3, %p731_p1 }
  0x55   : > { %741 = shalt.err (!%p738_p5)
}
  0x56   : > { %s742_s25 = scalar_lea.vmem %s1029_s7, 128  ;;  %s849_s4 = smov [#allocation3]  }
  0x57   : > { %p743_p9 = scmp.ne.s32.totalorder %s1029_s7, %s742_s25  ;;  %s747_s5 = sshll.u32 %s849_s4, 4  ;;  %s748_s5 = int_to_ptr.vmem [resolvable:$false] %s747_s5 }
  0x58   : > { %s749_s21 = scalar_lea.vmem %s748_s5, 256  ;;  %p750_p7 = scmp.lt.s32.totalorder %s1029_s7, %s748_s5 }
  0x59   : > { %p745_p11 = pnand %p743_p9, %p729_p12  ;;  %p751_p4 = scmp.lt.s32.totalorder %s749_s21, %s742_s25 }
  0x5b   : > { %p746_p0 = pneg %p745_p11  ;;  %p752_p13 = por %p751_p4, %p750_p7 }
  0x5d   : > { %p753_p6 = pnand %p752_p13, %p746_p0 }
  0x5f   : > { %756 = shalt.err (!%p753_p6)
}
  0x60   : > { %603 = dma.hbm_to_vmem [thread:$0]  (!%p1025_p2), %s1021_s6, 128, %s1029_s7, %s179_s26  }
  0x61   : > { %199 = sbr.rel (%p928_p8) target bundleno = 684 (0x2ac), region = 32  ;;  %s1059_s9 = sand.u32 (!%p928_p8), 1, %s827_s13  }
  0x62   : > { %s494_s10 = sshll.u32 (!%p928_p8), %s1059_s9, 3  ;;  %s202_s18 = scalar_lea.sflag (!%p928_p8), [#allocation4], %s1059_s9 }
  0x63   : > { %s1065_s19 = scalar_lea.vmem (!%p928_p8), [#allocation3], %s494_s10  ;;  %p1147_p7 = scmp.ne.s32.totalorder (!%p928_p8), %s1141_s22, 0 }
  0x68   : > { %810 = dma.done.wait (%p1147_p7), %s202_s18, 128  }
  0x69   : > { %812 = vsyncadd (%p1147_p7), %s202_s18, 4294967168  ;;  %p1148_p2 = scmp.ne.s32.totalorder %s1139_s20, 0 }
  0x6b   : > { %814 = dma.done.wait (%p1148_p2), [#allocation7], 2176  }
  0x6c   : > { %816 = vsyncadd (%p1148_p2), [#allocation7], 4294965120  ;;  %v850_v0 = vmov 0.0|0.0   ;;  %vm851_vm0 = vmmov 0   ;;  %v852_v1 = vmov 0.0   ;;  %v244_v2 = vld [vmem:[#allocation6] sm:$0xff]  ;;  %v344_v27 = vlaneseq }
  0x6d   : > { %557 = vmatprep.subr.bf16.mxu0 %v850_v0  ;;  %554 = vmatprep.mubr.msk.f32.mxu0 %vm851_vm0, %v852_v1  ;;  %v245_v3 = vld [vmem:[#allocation6 + $0x8] sm:$0xff]  ;;  %v246_v4 = vld [vmem:[#allocation6 + $0x10] sm:$0xff]  ;;  %v247_v6 = vld [vmem:[#allocation6 + $0x18] sm:$0xff]  ;;  %s502_s20 = sshll.u32 %s835_s15, 7  ;;  %s235_s22 = scalar_lea.vmem [#allocation9], %s494_s10 }
  0x6e   : > { %v558_v5 = vpack.c.bf16 %v245_v3, %v244_v2  ;;  %v561_v7 = vpack.c.bf16 %v247_v6, %v246_v4  ;;  %v248_v8 = vld [vmem:[#allocation6 + $0x20] sm:$0xff]  ;;  %v249_v9 = vld [vmem:[#allocation6 + $0x28] sm:$0xff]  ;;  %v250_v11 = vld [vmem:[#allocation6 + $0x30] sm:$0xff]  ;;  %v345_v28 = vand.u32 127, %v344_v27  ;;  %s385_s24 = sshll.u32 %s235_s22, 4  ;;  %s1082_s8 = scalar_lea.hbm %s1134_s3, %s502_s20  ;;  %s1084_s24 = int_to_ptr.vmem [resolvable:$true] %s385_s24 }
  0x6f   : > { %v564_v10 = vpack.c.bf16 %v249_v9, %v248_v8  ;;  %v251_v12 = vld [vmem:[#allocation6 + $0x38] sm:$0xff]  ;;  %v252_v14 = vld [vmem:[#allocation6 + $0x40] sm:$0xff]  ;;  %v253_v15 = vld [vmem:[#allocation6 + $0x48] sm:$0xff]  ;;  %s372_s26 = scalar_lea.sflag [#allocation5], %s1059_s9  ;;  %s757_s29 = scalar_lea.vmem %s1084_s24, 128 }
  0x70   : > { %559 = vmatpush3.bf16.msra.mxu0 %v558_v5  ;;  %v567_v13 = vpack.c.bf16 %v251_v12, %v250_v11  ;;  %v570_v16 = vpack.c.bf16 %v253_v15, %v252_v14  ;;  %v254_v17 = vld [vmem:[#allocation6 + $0x50] sm:$0xff]  ;;  %v255_v18 = vld [vmem:[#allocation6 + $0x58] sm:$0xff]  ;;  %v256_v20 = vld [vmem:[#allocation6 + $0x60] sm:$0xff]  ;;  %vm346_vm1 = vcmp.lt.s32.totalorder %v345_v28, 32  ;;  %p758_p8 = scmp.ne.s32.totalorder %s1084_s24, %s757_s29  ;;  %p1149_p12 = scmp.ne.s32.totalorder %s1145_s27, 0 }
  0x71   : > { %560 = vmatprep.subr.bf16.mxu0 %v850_v0  ;;  %v573_v19 = vpack.c.bf16 %v255_v18, %v254_v17  ;;  %v257_v21 = vld [vmem:[#allocation6 + $0x68] sm:$0xff]  ;;  %v258_v23 = vld [vmem:[#allocation6 + $0x70] sm:$0xff]  ;;  %v259_v24 = vld [vmem:[#allocation6 + $0x78] sm:$0xff]  ;;  %s853_s15 = smov [#allocation9]  }
  0x72   : > { %v576_v22 = vpack.c.bf16 %v257_v21, %v256_v20  ;;  %v579_v25 = vpack.c.bf16 %v259_v24, %v258_v23  ;;  %v243_v26 = vld [vmem:[%s1065_s19] sm:$0xff]  ;;  %v498_v29 = vld [vmem:[#allocation8] ss:$0 sm:$0xff]  ;;  %v499_v43 = vld [vmem:[#allocation8 + $0x1] ss:$0 sm:$0xff]  ;;  %p759_p1 = pnand %p758_p8, %p1149_p12  ;;  %s761_s28 = sshll.u32 %s853_s15, 4  ;;  %s762_s28 = int_to_ptr.vmem [resolvable:$false] %s761_s28 }
  0x73   : > { %v500_v45 = vld [vmem:[#allocation8 + $0x2] ss:$0 sm:$0xff]  ;;  %s763_s25 = scalar_lea.vmem %s762_s28, 256  ;;  %p764_p3 = scmp.lt.s32.totalorder %s1084_s24, %s762_s28 }
  0x74   : > { %562 = vmatpush3.bf16.msra.mxu0 %v561_v7  ;;  %p760_p10 = pneg %p759_p1  ;;  %p765_p5 = scmp.lt.s32.totalorder %s763_s25, %s757_s29 }
  0x75   : > { %563 = vmatprep.subr.bf16.mxu0 %v850_v0 }
  0x76   : > { %p766_p9 = por %p765_p5, %p764_p3 }
  0x78   : > { %565 = vmatpush3.bf16.msra.mxu0 %v564_v10  ;;  %p767_p11 = pnand %p766_p9, %p760_p10 }
  0x79   : > { %566 = vmatprep.subr.bf16.mxu0 %v850_v0 }
  0x7c   : > { %568 = vmatpush3.bf16.msra.mxu0 %v567_v13 }
  0x7d   : > { %569 = vmatprep.subr.bf16.mxu0 %v850_v0 }
  0x80   : > { %571 = vmatpush3.bf16.msra.mxu0 %v570_v16 }
  0x81   : > { %572 = vmatprep.subr.bf16.mxu0 %v850_v0 }
  0x84   : > { %574 = vmatpush3.bf16.msra.mxu0 %v573_v19 }
  0x85   : > { %575 = vmatprep.subr.bf16.mxu0 %v850_v0 }
  0x88   : > { %577 = vmatpush3.bf16.msra.mxu0 %v576_v22 }
  0x89   : > { %578 = vmatprep.subr.bf16.mxu0 %v850_v0 }
  0x8c   : > { %580 = vmatpush3.bf16.msra.mxu0 %v579_v25 }
  0x8f   : > { %555 = vmatmul.mubr.f32.vlgmr.msra.gmra.mrb[0].mxu0 %v243_v26 }
 0x162   : > { %v326_v30 = vpop.f32.mrb[0].mxu0 }
 0x163   : > { %v343_v31 = vadd.f32 %v498_v29, %v326_v30  ;;  %v556_v32 = vpop.f32.mrb[1].mxu0 }
 0x165   : > { %v347_v33 = vsel %vm346_vm1, %v343_v31, 0.0 }
 0x166   : > { %348 = vadd.xlane.f32.xlu0 %v347_v33 }
 0x1f3   : > { %v349_v34 = vpop.xlane.xlu0 %348 }
 0x1f4   : > { %v350_v35 = vmul.f32 0.03125, %v349_v34 }
 0x1f6   : > { %v351_v36 = vsub.f32 %v343_v31, %v350_v35 }
 0x1f8   : > { %v352_v37 = vsel %vm346_vm1, %v351_v36, 0.0 }
 0x1f9   : > { %v353_v38 = vmul.f32 %v352_v37, %v352_v37 }
 0x1fb   : > { %354 = vadd.xlane.f32.xlu0 %v353_v38 }
 0x288   : > { %v355_v39 = vpop.xlane.xlu0 %354 }
 0x289   : > { %v356_v40 = vmul.f32 0.03125, %v355_v39 }
 0x28b   : > { %v357_v41 = vadd.f32 1e-05, %v356_v40 }
 0x28d   : > { %669 = vrsqrt.f32 %v357_v41 }
 0x297   : > { %v670_v42 = vpop.eup %669 }
 0x298   : > { %v359_v44 = vmul.f32 %v670_v42, %v352_v37 }
 0x29a   : > { %v364_v46 = vmul.f32 %v499_v43, %v359_v44 }
 0x29c   : > { %v369_v47 = vadd.f32 %v500_v45, %v364_v46 }
 0x29e   : > { %370 = vst [vmem:[%s235_s22] sm:$0xff] %v369_v47 }
 0x29f   : > { %770 = shalt.err (!%p767_p11)
}
 0x2a0   : > { %s771_s4 = scalar_lea.hbm %s1082_s8, 128  ;;  %s775_s9 = scalar_lea.hbm %s1134_s3, 256 }
 0x2a1   : > { %p772_p0 = scmp.ne.s32.totalorder %s1082_s8, %s771_s4  ;;  %p776_p6 = scmp.lt.u32.totalorder %s1082_s8, %s1134_s3 }
 0x2a2   : > { %p777_p7 = scmp.lt.u32.totalorder %s775_s9, %s771_s4  ;;  %p779_p8 = scmp.lt.u32.totalorder %s771_s4, %s1082_s8 }
 0x2a3   : > { %p773_p4 = pnand %p772_p0, %p1149_p12 }
 0x2a4   : > { %p778_p2 = por %p777_p7, %p776_p6 }
 0x2a5   : > { %p774_p13 = pneg %p773_p4 }
 0x2a6   : > { %p780_p1 = por %p779_p8, %p778_p2 }
 0x2a8   : > { %p781_p10 = pnand %p780_p1, %p774_p13 }
 0x2aa   : > { %784 = shalt.err (!%p781_p10)
}
 0x2ab   : > { %591 = dma.vmem_to_hbm [thread:$0]  (%p1149_p12), %s1084_s24, 128, %s1082_s8, %s372_s26  }
 0x2ac PF: > { %s397_s19 = sand.u32 1, %s823_s12   ;;  %p1150_p3 = scmp.ne.s32.totalorder %s1142_s23, 0 }
 0x2ad   : > { %p1151_p5 = scmp.ge.s32.totalorder %s843_s17, 2  ;;  %s398_s20 = scalar_lea.sflag [#allocation5], %s397_s19 }
 0x2af   : > { %p605_p9 = pnand %p1151_p5, %p1150_p3 }
 0x2b1   : > { %818 = dma.done.wait (!%p605_p9), %s398_s20, 128  }
 0x2b2   : > { %820 = vsyncadd (!%p605_p9), %s398_s20, 4294967168  ;;  %s20_s17 = sadd.s32 1, %s843_s17   ;;  %s1152_s12 = smov %s827_s13 }
 0x2b3   : > { %p17_p11 = scmp.ge.s32.totalorder %s20_s17, 4   ;;  %s1153_s13 = smov %s831_s14 }
 0x2b4   : > { %s1154_s14 = smov %s1016_s30  ;;  %s1155_s15 = smov %s839_s16 }
 0x2b5   : > { %s1156_s16 = smov %s1158_s11  ;;  %19 = sbr.rel (!%p17_p11) target bundleno = 7 (0x7), region = 94 }
 0x2bc   :  { %403 = vsyncpa [#allocation4], 1 }
 0x2bd   :  { %405 = vsyncpa [#allocation4 + $0x1], 1 }
 0x2be   :  { %406 = vsyncpa [#allocation7], 1 }
 0x2bf   :  { %407 = vsyncpa [#allocation5], 1 }
 0x2c0   :  { %409 = vsyncpa [#allocation5 + $0x1], 1 }

// kernel: tpu_custom_call.1
= control target key start
LH: loop header
LB: loop body
LE: loop exit
PB: predicated region body
PF: predicated region fallthrough
CT: control target
= control target key end

     0   :  { %8 = vsyncpa [#allocation4], 0  ;;  %s1131_s0 = inlined_call_operand.hbm [shape: f32[16,128], index: 0, kind: input, shape index: {}]   ;;  %s1132_s1 = inlined_call_operand.hbm [shape: f32[128,128], index: 1, kind: input, shape index: {}]   ;;  %s1133_s2 = inlined_call_operand.hbm [shape: f32[8,128], index: 2, kind: input, shape index: {}]   ;;  %s1134_s3 = inlined_call_operand.hbm [shape: f32[16,128], index: 3, kind: output, shape index: {}]  }
   0x1   :  { %10 = vsyncpa [#allocation4 + $0x1], 0 }
   0x2   :  { %11 = vsyncpa [#allocation7], 0 }
   0x3   :  { %12 = vsyncpa [#allocation5], 0 }
   0x4   :  { %14 = vsyncpa [#allocation5 + $0x1], 0  ;;  %s874_s12 = smov 0   ;;  %s876_s13 = smov 0  }
   0x5   :  { %s878_s14 = smov 0   ;;  %s880_s15 = smov 0  }
   0x6   :  { %s882_s16 = smov 0   ;;  %s884_s17 = smov 0  }
   0x7 LB: > { %s485_s18 = sadd.s32 4294967295, %s843_s17   ;;  %s486_s19 = sadd.s32 4294967294, %s843_s17   ;;  %s843_s17 = sphi %s884_s17, %s20_s17   ;;  %s839_s16 = sphi %s882_s16, %s1156_s16   ;;  %s835_s15 = sphi %s880_s15, %s1155_s15   ;;  %s831_s14 = sphi %s878_s14, %s1154_s14   ;;  %s827_s13 = sphi %s876_s13, %s1153_s13   ;;  %s823_s12 = sphi %s874_s12, %s1152_s12  }
   0x8   : > { %p54_p0 = scmp.ne.s32.totalorder %s827_s13, %s823_s12  ;;  %p908_p1 = scmp.eq.s32.totalorder %s485_s18, 0 }
   0x9   : > { %p912_p2 = scmp.eq.s32.totalorder %s485_s18, 1  ;;  %p131_p3 = scmp.eq.s32.totalorder %s486_s19, 1 }
   0xa   : > { %s1139_s20 = scalar_select %p908_p1, 1, 0 }
   0xb   : > { %p918_p4 = por %p908_p1, %p54_p0  ;;  %p487_p5 = scmp.ge.s32.totalorder %s843_s17, 1 }
   0xc   : > { %p923_p6 = por %p131_p3, %p54_p0  ;;  %p138_p7 = scmp.lt.s32.totalorder %s843_s17, 3 }
   0xd   : > { %s1141_s22 = scalar_select %p918_p4, 1, 0 }
   0xe   : > { %s1142_s23 = scalar_select %p923_p6, 1, 0 }
   0xf   : > { %p928_p8 = pnand %p487_p5, %p138_p7  ;;  %s845_s25 = smov [#allocation6]  }
  0x10   : > { %s153_s26 = sshll.u32 %s845_s25, 4  ;;  %s846_s28 = smov [#allocation8]   ;;  %s932_s26 = int_to_ptr.vmem [resolvable:$true] %s153_s26 }
  0x11   : > { %p593_p9 = pneg %p928_p8  ;;  %s167_s29 = sshll.u32 %s846_s28, 4  ;;  %s943_s29 = int_to_ptr.vmem [resolvable:$true] %s167_s29 }
  0x12   : > { %s671_s5 = scalar_lea.hbm %s1132_s1, 2048 }
  0x13   : > { %p939_p11 = pnand %p593_p9, %p908_p1  ;;  %p672_p12 = scmp.ne.s32.totalorder %s1132_s1, %s671_s5 }
  0x14   : > { %p678_p5 = scmp.lt.u32.totalorder %s671_s5, %s1132_s1 }
  0x15   : > { %p673_p13 = pneg %p939_p11 }
  0x17   : > { %p674_p0 = pnand %p673_p13, %p672_p12 }
  0x19   : > { %p675_p3 = pneg %p674_p0 }
  0x1b   : > { %p680_p7 = pnand %p678_p5, %p675_p3 }
  0x1d   : > { %683 = shalt.err (!%p680_p7)
}
  0x1e   : > { %s684_s10 = scalar_lea.vmem %s932_s26, 2048  ;;  %p692_p1 = scmp.lt.s32.totalorder %s932_s26, %s932_s26 }
  0x1f   : > { %p685_p9 = scmp.ne.s32.totalorder %s932_s26, %s684_s10  ;;  %p693_p12 = scmp.lt.s32.totalorder %s684_s10, %s684_s10 }
  0x21   : > { %p687_p10 = pnand %p685_p9, %p673_p13  ;;  %p694_p0 = por %p693_p12, %p692_p1 }
  0x23   : > { %p688_p6 = pneg %p687_p10 }
  0x25   : > { %p695_p4 = pnand %p694_p0, %p688_p6 }
  0x27   : > { %698 = shalt.err (!%p695_p4)
}
  0x28   : > { %s847_s11 = smov 128   ;;  %s848_s18 = smov 8  }
  0x29   : > { %596 = dma.hbm_to_vmem [thread:$0]  (!%p939_p11), %s1132_s1, 2048, %s932_s26, [#allocation7], %s847_s11, %s847_s11, %s848_s18  }
  0x2a   : > { %s699_s4 = scalar_lea.hbm %s1133_s2, 128 }
  0x2b   : > { %p700_p1 = scmp.ne.s32.totalorder %s1133_s2, %s699_s4  ;;  %p706_p10 = scmp.lt.u32.totalorder %s699_s4, %s1133_s2 }
  0x2d   : > { %p702_p4 = pnand %p700_p1, %p673_p13 }
  0x2f   : > { %p703_p6 = pneg %p702_p4 }
  0x31   : > { %p708_p3 = pnand %p706_p10, %p703_p6 }
  0x33   : > { %711 = shalt.err (!%p708_p3)
}
  0x34   : > { %s712_s26 = scalar_lea.vmem %s943_s29, 128  ;;  %p720_p12 = scmp.lt.s32.totalorder %s943_s29, %s943_s29 }
  0x35   : > { %p713_p5 = scmp.ne.s32.totalorder %s943_s29, %s712_s26  ;;  %p721_p0 = scmp.lt.s32.totalorder %s712_s26, %s712_s26 }
  0x37   : > { %p715_p7 = pnand %p713_p5, %p673_p13  ;;  %p722_p1 = por %p721_p0, %p720_p12 }
  0x39   : > { %p716_p9 = pneg %p715_p7 }
  0x3b   : > { %p723_p4 = pnand %p722_p1, %p716_p9 }
  0x3d   : > { %726 = shalt.err (!%p723_p4)
}
  0x3e   : > { %599 = dma.hbm_to_vmem [thread:$0]  (!%p939_p11), %s1133_s2, 128, %s943_s29, [#allocation7]  }
  0x3f   : > { %s32_s11 = sadd.s32 1, %s839_s16  ;;  %s41_s18 = sadd.s32 1, %s831_s14 }
  0x40   : > { %p34_p13 = scmp.ge.s32.totalorder %s32_s11, 2  ;;  %p48_p6 = scmp.ne.s32.totalorder %s831_s14, %s827_s13 }
  0x41   : > { %p49_p10 = scmp.eq.s32.totalorder %s843_s17, 0  ;;  %p610_p3 = scmp.lt.s32.totalorder %s843_s17, 2 }
  0x42   : > { %s1158_s11 = smov (%p34_p13, %s32_s11), 0  ;;  %p1007_p7 = por %p912_p2, %p48_p6 }
  0x43   : > { %p50_p5 = por %p49_p10, %p48_p6  ;;  %s36_s19 = ssub.s32 %s839_s16, %s1158_s11 }
  0x44   : > { %s1145_s27 = scalar_select %p1007_p7, 1, 0 }
  0x45   : > { %s178_s25 = sand.u32 1, %s831_s14   ;;  %p39_p9 = scmp.eq.s32.totalorder %s36_s19, 0 }
  0x46   : > { %s491_s29 = sshll.u32 %s178_s25, 3  ;;  %s492_s28 = sshll.u32 %s839_s16, 7 }
  0x47   : > { %s1016_s30 = scalar_select %p39_p9, %s831_s14, %s41_s18  }
  0x48   : > { %s1021_s6 = scalar_lea.hbm %s1131_s0, %s492_s28  ;;  %s182_s21 = scalar_lea.vmem [#allocation3], %s491_s29 }
  0x49   : > { %s190_s7 = sshll.u32 %s182_s21, 4  ;;  %p1025_p2 = pnand %p610_p3, %p50_p5  ;;  %s1029_s7 = int_to_ptr.vmem [resolvable:$true] %s190_s7 }
  0x4a   : > { %s179_s26 = scalar_lea.sflag [#allocation4], %s178_s25  ;;  %s727_s9 = scalar_lea.hbm %s1021_s6, 128 }
  0x4b   : > { %p728_p11 = scmp.ne.s32.totalorder %s1021_s6, %s727_s9  ;;  %p729_p12 = pneg %p1025_p2 }
  0x4c   : > { %s732_s19 = scalar_lea.hbm %s1131_s0, 256  ;;  %p733_p4 = scmp.lt.u32.totalorder %s1021_s6, %s1131_s0 }
  0x4d   : > { %p730_p0 = pnand %p729_p12, %p728_p11  ;;  %p734_p13 = scmp.lt.u32.totalorder %s732_s19, %s727_s9 }
  0x4e   : > { %p736_p10 = scmp.lt.u32.totalorder %s727_s9, %s1021_s6 }
  0x4f   : > { %p731_p1 = pneg %p730_p0  ;;  %p735_p6 = por %p734_p13, %p733_p4 }
  0x51   : > { %p737_p3 = por %p736_p10, %p735_p6 }
  0x53   : > { %p738_p5 = pnand %p737_p3, %p731_p1 }
  0x55   : > { %741 = shalt.err (!%p738_p5)
}
  0x56   : > { %s742_s25 = scalar_lea.vmem %s1029_s7, 128  ;;  %s849_s4 = smov [#allocation3]  }
  0x57   : > { %p743_p9 = scmp.ne.s32.totalorder %s1029_s7, %s742_s25  ;;  %s747_s5 = sshll.u32 %s849_s4, 4  ;;  %s748_s5 = int_to_ptr.vmem [resolvable:$false] %s747_s5 }
  0x58   : > { %s749_s21 = scalar_lea.vmem %s748_s5, 256  ;;  %p750_p7 = scmp.lt.s32.totalorder %s1029_s7, %s748_s5 }
  0x59   : > { %p745_p11 = pnand %p743_p9, %p729_p12  ;;  %p751_p4 = scmp.lt.s32.totalorder %s749_s21, %s742_s25 }
  0x5b   : > { %p746_p0 = pneg %p745_p11  ;;  %p752_p13 = por %p751_p4, %p750_p7 }
  0x5d   : > { %p753_p6 = pnand %p752_p13, %p746_p0 }
  0x5f   : > { %756 = shalt.err (!%p753_p6)
}
  0x60   : > { %603 = dma.hbm_to_vmem [thread:$0]  (!%p1025_p2), %s1021_s6, 128, %s1029_s7, %s179_s26  }
  0x61   : > { %199 = sbr.rel (%p928_p8) target bundleno = 684 (0x2ac), region = 32  ;;  %s1059_s9 = sand.u32 (!%p928_p8), 1, %s827_s13  }
  0x62   : > { %s494_s10 = sshll.u32 (!%p928_p8), %s1059_s9, 3  ;;  %s202_s18 = scalar_lea.sflag (!%p928_p8), [#allocation4], %s1059_s9 }
  0x63   : > { %s1065_s19 = scalar_lea.vmem (!%p928_p8), [#allocation3], %s494_s10  ;;  %p1147_p7 = scmp.ne.s32.totalorder (!%p928_p8), %s1141_s22, 0 }
  0x68   : > { %810 = dma.done.wait (%p1147_p7), %s202_s18, 128  }
  0x69   : > { %812 = vsyncadd (%p1147_p7), %s202_s18, 4294967168  ;;  %p1148_p2 = scmp.ne.s32.totalorder %s1139_s20, 0 }
  0x6b   : > { %814 = dma.done.wait (%p1148_p2), [#allocation7], 2176  }
  0x6c   : > { %816 = vsyncadd (%p1148_p2), [#allocation7], 4294965120  ;;  %v850_v0 = vmov 0.0|0.0   ;;  %vm851_vm0 = vmmov 0   ;;  %v852_v1 = vmov 0.0   ;;  %v244_v2 = vld [vmem:[#allocation6] sm:$0xff]  ;;  %v344_v27 = vlaneseq }
  0x6d   : > { %557 = vmatprep.subr.bf16.mxu0 %v850_v0  ;;  %554 = vmatprep.mubr.msk.f32.mxu0 %vm851_vm0, %v852_v1  ;;  %v245_v3 = vld [vmem:[#allocation6 + $0x8] sm:$0xff]  ;;  %v246_v4 = vld [vmem:[#allocation6 + $0x10] sm:$0xff]  ;;  %v247_v6 = vld [vmem:[#allocation6 + $0x18] sm:$0xff]  ;;  %s502_s20 = sshll.u32 %s835_s15, 7  ;;  %s235_s22 = scalar_lea.vmem [#allocation9], %s494_s10 }
  0x6e   : > { %v558_v5 = vpack.c.bf16 %v245_v3, %v244_v2  ;;  %v561_v7 = vpack.c.bf16 %v247_v6, %v246_v4  ;;  %v248_v8 = vld [vmem:[#allocation6 + $0x20] sm:$0xff]  ;;  %v249_v9 = vld [vmem:[#allocation6 + $0x28] sm:$0xff]  ;;  %v250_v11 = vld [vmem:[#allocation6 + $0x30] sm:$0xff]  ;;  %v345_v28 = vand.u32 127, %v344_v27  ;;  %s385_s24 = sshll.u32 %s235_s22, 4  ;;  %s1082_s8 = scalar_lea.hbm %s1134_s3, %s502_s20  ;;  %s1084_s24 = int_to_ptr.vmem [resolvable:$true] %s385_s24 }
  0x6f   : > { %v564_v10 = vpack.c.bf16 %v249_v9, %v248_v8  ;;  %v251_v12 = vld [vmem:[#allocation6 + $0x38] sm:$0xff]  ;;  %v252_v14 = vld [vmem:[#allocation6 + $0x40] sm:$0xff]  ;;  %v253_v15 = vld [vmem:[#allocation6 + $0x48] sm:$0xff]  ;;  %s372_s26 = scalar_lea.sflag [#allocation5], %s1059_s9  ;;  %s757_s29 = scalar_lea.vmem %s1084_s24, 128 }
  0x70   : > { %559 = vmatpush3.bf16.msra.mxu0 %v558_v5  ;;  %v567_v13 = vpack.c.bf16 %v251_v12, %v250_v11  ;;  %v570_v16 = vpack.c.bf16 %v253_v15, %v252_v14  ;;  %v254_v17 = vld [vmem:[#allocation6 + $0x50] sm:$0xff]  ;;  %v255_v18 = vld [vmem:[#allocation6 + $0x58] sm:$0xff]  ;;  %v256_v20 = vld [vmem:[#allocation6 + $0x60] sm:$0xff]  ;;  %vm346_vm1 = vcmp.lt.s32.totalorder %v345_v28, 32  ;;  %p758_p8 = scmp.ne.s32.totalorder %s1084_s24, %s757_s29  ;;  %p1149_p12 = scmp.ne.s32.totalorder %s1145_s27, 0 }
  0x71   : > { %560 = vmatprep.subr.bf16.mxu0 %v850_v0  ;;  %v573_v19 = vpack.c.bf16 %v255_v18, %v254_v17  ;;  %v257_v21 = vld [vmem:[#allocation6 + $0x68] sm:$0xff]  ;;  %v258_v23 = vld [vmem:[#allocation6 + $0x70] sm:$0xff]  ;;  %v259_v24 = vld [vmem:[#allocation6 + $0x78] sm:$0xff]  ;;  %s853_s15 = smov [#allocation9]  }
  0x72   : > { %v576_v22 = vpack.c.bf16 %v257_v21, %v256_v20  ;;  %v579_v25 = vpack.c.bf16 %v259_v24, %v258_v23  ;;  %v243_v26 = vld [vmem:[%s1065_s19] sm:$0xff]  ;;  %v498_v29 = vld [vmem:[#allocation8] ss:$0 sm:$0xff]  ;;  %v499_v43 = vld [vmem:[#allocation8 + $0x1] ss:$0 sm:$0xff]  ;;  %p759_p1 = pnand %p758_p8, %p1149_p12  ;;  %s761_s28 = sshll.u32 %s853_s15, 4  ;;  %s762_s28 = int_to_ptr.vmem [resolvable:$false] %s761_s28 }
  0x73   : > { %v500_v45 = vld [vmem:[#allocation8 + $0x2] ss:$0 sm:$0xff]  ;;  %s763_s25 = scalar_lea.vmem %s762_s28, 256  ;;  %p764_p3 = scmp.lt.s32.totalorder %s1084_s24, %s762_s28 }
  0x74   : > { %562 = vmatpush3.bf16.msra.mxu0 %v561_v7  ;;  %p760_p10 = pneg %p759_p1  ;;  %p765_p5 = scmp.lt.s32.totalorder %s763_s25, %s757_s29 }
  0x75   : > { %563 = vmatprep.subr.bf16.mxu0 %v850_v0 }
  0x76   : > { %p766_p9 = por %p765_p5, %p764_p3 }
  0x78   : > { %565 = vmatpush3.bf16.msra.mxu0 %v564_v10  ;;  %p767_p11 = pnand %p766_p9, %p760_p10 }
  0x79   : > { %566 = vmatprep.subr.bf16.mxu0 %v850_v0 }
  0x7c   : > { %568 = vmatpush3.bf16.msra.mxu0 %v567_v13 }
  0x7d   : > { %569 = vmatprep.subr.bf16.mxu0 %v850_v0 }
  0x80   : > { %571 = vmatpush3.bf16.msra.mxu0 %v570_v16 }
  0x81   : > { %572 = vmatprep.subr.bf16.mxu0 %v850_v0 }
  0x84   : > { %574 = vmatpush3.bf16.msra.mxu0 %v573_v19 }
  0x85   : > { %575 = vmatprep.subr.bf16.mxu0 %v850_v0 }
  0x88   : > { %577 = vmatpush3.bf16.msra.mxu0 %v576_v22 }
  0x89   : > { %578 = vmatprep.subr.bf16.mxu0 %v850_v0 }
  0x8c   : > { %580 = vmatpush3.bf16.msra.mxu0 %v579_v25 }
  0x8f   : > { %555 = vmatmul.mubr.f32.vlgmr.msra.gmra.mrb[0].mxu0 %v243_v26 }
 0x162   : > { %v326_v30 = vpop.f32.mrb[0].mxu0 }
 0x163   : > { %v343_v31 = vadd.f32 %v498_v29, %v326_v30  ;;  %v556_v32 = vpop.f32.mrb[1].mxu0 }
 0x165   : > { %v347_v33 = vsel %vm346_vm1, %v343_v31, 0.0 }
 0x166   : > { %348 = vadd.xlane.f32.xlu0 %v347_v33 }
 0x1f3   : > { %v349_v34 = vpop.xlane.xlu0 %348 }
 0x1f4   : > { %v350_v35 = vmul.f32 0.03125, %v349_v34 }
 0x1f6   : > { %v351_v36 = vsub.f32 %v343_v31, %v350_v35 }
 0x1f8   : > { %v352_v37 = vsel %vm346_vm1, %v351_v36, 0.0 }
 0x1f9   : > { %v353_v38 = vmul.f32 %v352_v37, %v352_v37 }
 0x1fb   : > { %354 = vadd.xlane.f32.xlu0 %v353_v38 }
 0x288   : > { %v355_v39 = vpop.xlane.xlu0 %354 }
 0x289   : > { %v356_v40 = vmul.f32 0.03125, %v355_v39 }
 0x28b   : > { %v357_v41 = vadd.f32 1e-05, %v356_v40 }
 0x28d   : > { %669 = vrsqrt.f32 %v357_v41 }
 0x297   : > { %v670_v42 = vpop.eup %669 }
 0x298   : > { %v359_v44 = vmul.f32 %v670_v42, %v352_v37 }
 0x29a   : > { %v364_v46 = vmul.f32 %v499_v43, %v359_v44 }
 0x29c   : > { %v369_v47 = vadd.f32 %v500_v45, %v364_v46 }
 0x29e   : > { %370 = vst [vmem:[%s235_s22] sm:$0xff] %v369_v47 }
 0x29f   : > { %770 = shalt.err (!%p767_p11)
}
 0x2a0   : > { %s771_s4 = scalar_lea.hbm %s1082_s8, 128  ;;  %s775_s9 = scalar_lea.hbm %s1134_s3, 256 }
 0x2a1   : > { %p772_p0 = scmp.ne.s32.totalorder %s1082_s8, %s771_s4  ;;  %p776_p6 = scmp.lt.u32.totalorder %s1082_s8, %s1134_s3 }
 0x2a2   : > { %p777_p7 = scmp.lt.u32.totalorder %s775_s9, %s771_s4  ;;  %p779_p8 = scmp.lt.u32.totalorder %s771_s4, %s1082_s8 }
 0x2a3   : > { %p773_p4 = pnand %p772_p0, %p1149_p12 }
 0x2a4   : > { %p778_p2 = por %p777_p7, %p776_p6 }
 0x2a5   : > { %p774_p13 = pneg %p773_p4 }
 0x2a6   : > { %p780_p1 = por %p779_p8, %p778_p2 }
 0x2a8   : > { %p781_p10 = pnand %p780_p1, %p774_p13 }
 0x2aa   : > { %784 = shalt.err (!%p781_p10)
}
 0x2ab   : > { %591 = dma.vmem_to_hbm [thread:$0]  (%p1149_p12), %s1084_s24, 128, %s1082_s8, %s372_s26  }
 0x2ac PF: > { %s397_s19 = sand.u32 1, %s823_s12   ;;  %p1150_p3 = scmp.ne.s32.totalorder %s1142_s23, 0 }
 0x2ad   : > { %p1151_p5 = scmp.ge.s32.totalorder %s843_s17, 2  ;;  %s398_s20 = scalar_lea.sflag [#allocation5], %s397_s19 }
 0x2af   : > { %p605_p9 = pnand %p1151_p5, %p1150_p3 }
 0x2b1   : > { %818 = dma.done.wait (!%p605_p9), %s398_s20, 128  }
 0x2b2   : > { %820 = vsyncadd (!%p605_p9), %s398_s20, 4294967168  ;;  %s20_s17 = sadd.s32 1, %s843_s17   ;;  %s1152_s12 = smov %s827_s13 }
 0x2b3   : > { %p17_p11 = scmp.ge.s32.totalorder %s20_s17, 4   ;;  %s1153_s13 = smov %s831_s14 }
 0x2b4   : > { %s1154_s14 = smov %s1016_s30  ;;  %s1155_s15 = smov %s839_s16 }
 0x2b5   : > { %s1156_s16 = smov %s1158_s11  ;;  %19 = sbr.rel (!%p17_p11) target bundleno = 7 (0x7), region = 94 }
 0x2bc   :  { %403 = vsyncpa [#allocation4], 1 }
 0x2bd   :  { %405 = vsyncpa [#allocation4 + $0x1], 1 }
 0x2be   :  { %406 = vsyncpa [#allocation7], 1 }
 0x2bf   :  { %407 = vsyncpa [#allocation5], 1 }
 0x2c0   :  { %409 = vsyncpa [#allocation5 + $0x1], 1 }

</bundles_post_ra>
